<compile_context>
chip_gen: v6e
topology: v6e:2x2x1
jax: 0.10.0
libtpu: 0.0.40
codegen_flags: <defaults>
</compile_context>

<pallas_src>
import jax
import jax.numpy as jnp
from jax.experimental import pallas as pl
from jax.experimental.pallas import tpu as pltpu


def cdefunc_kernel(z_ref, w1_ref, b1_ref, w2_ref, b2_ref, out_ref):
    # linear1: (Bt, H) @ (H, 128) -> (Bt, 128), then ReLU
    h1 = jnp.dot(z_ref[...], w1_ref[...],
                 preferred_element_type=jnp.float32) + b1_ref[...]
    h1 = jnp.maximum(h1, 0.0)
    # linear2: (Bt, 128) @ (128, H*I) -> (Bt, H*I), then tanh (EUP)
    y = jnp.dot(h1, w2_ref[...],
                preferred_element_type=jnp.float32) + b2_ref[...]
    out_ref[...] = jnp.tanh(y)


def init_params(key, input_channels, hidden_channels):
    """Deterministic synthetic params, PyTorch-Linear-style uniform init.
    Weights are stored transposed relative to torch ((in, out)) so the kernel
    uses plain x @ W."""
    I, H = input_channels, hidden_channels
    ks = jax.random.split(key, 4)

    def lin(kw, kb, fan_in, fan_out):
        bound = 1.0 / (fan_in ** 0.5)
        w = jax.random.uniform(kw, (fan_in, fan_out), jnp.float32, -bound, bound)
        b = jax.random.uniform(kb, (1, fan_out), jnp.float32, -bound, bound)
        return w, b

    w1, b1 = lin(ks[0], ks[1], H, 128)        # self.linear1
    w2, b2 = lin(ks[2], ks[3], 128, H * I)    # self.linear2
    return dict(w1=w1, b1=b1, w2=w2, b2=b2)


def cdefunc_forward(t, z, params, *, b_tile=None):
    """CDEFunc.forward: t (ignored), z: (B, H)  ->  (B, H, I)."""
    del t  # the module takes t but does not use it
    B, H = z.shape
    N1 = params["w1"].shape[1]        # 128
    HI = params["w2"].shape[1]        # H * I
    I = HI // H

    # Pick a batch tile: at least 8 sublanes, at most 128 rows per grid step.
    if b_tile is None:
        b_tile = min(128, -(-B // 8) * 8)
    Bp = -(-B // b_tile) * b_tile
    z_p = jnp.pad(z.astype(jnp.float32), ((0, Bp - B), (0, 0)))

    # TODO(synk): for large-batch / throughput use, cast z_p, w1, w2 to
    # bfloat16 here (f32 accumulation is already requested in the kernel).

    vmem = pltpu.MemorySpace.VMEM

    def shared(shape):   # whole-array block, constant index across batch grid
        return pl.BlockSpec(shape, lambda b: tuple(0 for _ in shape),
                            memory_space=vmem)

    grid_spec = pltpu.PrefetchScalarGridSpec(
        num_scalar_prefetch=0,
        grid=(Bp // b_tile,),
        in_specs=[
            pl.BlockSpec((b_tile, H), lambda b: (b, 0), memory_space=vmem),
            shared((H, N1)),      # w1
            shared((1, N1)),      # b1
            shared((N1, HI)),     # w2
            shared((1, HI)),      # b2
        ],
        out_specs=pl.BlockSpec((b_tile, HI), lambda b: (b, 0),
                               memory_space=vmem),
    )

    out_flat = pl.pallas_call(
        cdefunc_kernel,
        out_shape=jax.ShapeDtypeStruct((Bp, HI), jnp.float32),
        grid_spec=grid_spec,
        compiler_params=pltpu.CompilerParams(
            # batch tiles are independent -> megacore can split them
            dimension_semantics=("parallel",),
            # conservative scoped-VMEM budget (fits v5e / v6e / v7x)
            vmem_limit_bytes=32 * 1024 * 1024,
        ),
    )(z_p, params["w1"], params["b1"], params["w2"], params["b2"])

    # torch: z.view(B, hidden_channels, input_channels)
    return out_flat[:B].reshape(B, H, I)


if __name__ == "__main__":
    key = jax.random.PRNGKey(0)
    input_channels, hidden_channels = 4, 32
    batch = 2

    kp, kz = jax.random.split(key)
    params = init_params(kp, input_channels, hidden_channels)
    z = jax.random.normal(kz, (batch, hidden_channels), jnp.float32)
    t = jnp.float32(0.0)

    out = cdefunc_forward(t, z, params)
    jax.block_until_ready(out)

    # Pure-JAX reference of CDEFunc.forward for a correctness gate.
    h1_ref = jnp.maximum(z @ params["w1"] + params["b1"], 0.0)
    ref = jnp.tanh(h1_ref @ params["w2"] + params["b2"]).reshape(
        batch, hidden_channels, input_channels)

    assert out.shape == (batch, hidden_channels, input_channels)
    assert bool(jnp.all(jnp.isfinite(out)))
    assert float(jnp.max(jnp.abs(out - ref))) < 1e-2
    print("KERNEL_OK")
</pallas_src>

<mosaic_0001>
module attributes {stable_mosaic.version = 11 : i64} {
  func.func @cdefunc_kernel(%arg0: i32, %arg1: memref<8x32xf32, #tpu.memory_space<vmem>>, %arg2: memref<32x128xf32, #tpu.memory_space<vmem>>, %arg3: memref<1x128xf32, #tpu.memory_space<vmem>>, %arg4: memref<128x128xf32, #tpu.memory_space<vmem>>, %arg5: memref<1x128xf32, #tpu.memory_space<vmem>>, %arg6: memref<8x128xf32, #tpu.memory_space<vmem>>) attributes {dimension_semantics = [#tpu.dimension_semantics<parallel>], iteration_bounds = array<i64: 1>, scalar_prefetch = 0 : i64, scratch_operands = 0 : i64, tpu.core_type = #tpu.core_type<tc>, window_params = [{transform_indices = @transform_0, window_bounds = array<i64: 8, 32>}, {pipeline_mode = #tpu.pipeline_mode<synchronous>, transform_indices = @transform_1, window_bounds = array<i64: 32, 128>}, {pipeline_mode = #tpu.pipeline_mode<synchronous>, transform_indices = @transform_2, window_bounds = array<i64: 1, 128>}, {pipeline_mode = #tpu.pipeline_mode<synchronous>, transform_indices = @transform_3, window_bounds = array<i64: 128, 128>}, {pipeline_mode = #tpu.pipeline_mode<synchronous>, transform_indices = @transform_4, window_bounds = array<i64: 1, 128>}, {transform_indices = @transform_5, window_bounds = array<i64: 8, 128>}]} {
    %c0 = arith.constant 0 : index
    %c0_0 = arith.constant 0 : index
    %0 = vector.load %arg1[%c0, %c0_0] : memref<8x32xf32, #tpu.memory_space<vmem>>, vector<8x32xf32>
    %c0_1 = arith.constant 0 : index
    %c0_2 = arith.constant 0 : index
    %1 = vector.load %arg2[%c0_1, %c0_2] : memref<32x128xf32, #tpu.memory_space<vmem>>, vector<32x128xf32>
    %cst = arith.constant dense<0.000000e+00> : vector<8x128xf32>
    %2 = tpu.matmul %0, %1, %cst {dimension_numbers = #tpu.dot_dimension_numbers<[1], [0], [0], [1], [0, 0, 1, 1], [], []>} : vector<8x32xf32>, vector<32x128xf32>, vector<8x128xf32> -> vector<8x128xf32>
    %c0_3 = arith.constant 0 : index
    %c0_4 = arith.constant 0 : index
    %3 = vector.load %arg3[%c0_3, %c0_4] : memref<1x128xf32, #tpu.memory_space<vmem>>, vector<1x128xf32>
    %4 = vector.broadcast %3 : vector<1x128xf32> to vector<8x128xf32>
    %5 = arith.addf %2, %4 : vector<8x128xf32>
    %cst_5 = arith.constant 0.000000e+00 : f32
    %6 = vector.broadcast %cst_5 : f32 to vector<8x128xf32>
    %7 = arith.maximumf %5, %6 : vector<8x128xf32>
    %c0_6 = arith.constant 0 : index
    %c0_7 = arith.constant 0 : index
    %8 = vector.load %arg4[%c0_6, %c0_7] : memref<128x128xf32, #tpu.memory_space<vmem>>, vector<128x128xf32>
    %cst_8 = arith.constant dense<0.000000e+00> : vector<8x128xf32>
    %9 = tpu.matmul %7, %8, %cst_8 {dimension_numbers = #tpu.dot_dimension_numbers<[1], [0], [0], [1], [0, 0, 1, 1], [], []>} : vector<8x128xf32>, vector<128x128xf32>, vector<8x128xf32> -> vector<8x128xf32>
    %c0_9 = arith.constant 0 : index
    %c0_10 = arith.constant 0 : index
    %10 = vector.load %arg5[%c0_9, %c0_10] : memref<1x128xf32, #tpu.memory_space<vmem>>, vector<1x128xf32>
    %11 = vector.broadcast %10 : vector<1x128xf32> to vector<8x128xf32>
    %12 = arith.addf %9, %11 : vector<8x128xf32>
    %13 = math.tanh %12 : vector<8x128xf32>
    %c0_11 = arith.constant 0 : index
    %c0_12 = arith.constant 0 : index
    %14 = vector.load %arg6[%c0_11, %c0_12] : memref<8x128xf32, #tpu.memory_space<vmem>>, vector<8x128xf32>
    tpu.vector_store %arg6[%c0_11, %c0_12], %13 {strides = array<i32>} : memref<8x128xf32, #tpu.memory_space<vmem>>, vector<8x128xf32>,
    return
  }
  func.func @transform_0(%arg0: i32) -> (i32, i32) {
    %c0_i32 = arith.constant 0 : i32
    %c0_i32_0 = arith.constant 0 : i32
    return %arg0, %c0_i32 : i32, i32
  }
  func.func @transform_1(%arg0: i32) -> (i32, i32) {
    %c0_i32 = arith.constant 0 : i32
    %c0_i32_0 = arith.constant 0 : i32
    %c0_i32_1 = arith.constant 0 : i32
    return %c0_i32, %c0_i32_0 : i32, i32
  }
  func.func @transform_2(%arg0: i32) -> (i32, i32) {
    %c0_i32 = arith.constant 0 : i32
    %c0_i32_0 = arith.constant 0 : i32
    %c0_i32_1 = arith.constant 0 : i32
    return %c0_i32, %c0_i32_0 : i32, i32
  }
  func.func @transform_3(%arg0: i32) -> (i32, i32) {
    %c0_i32 = arith.constant 0 : i32
    %c0_i32_0 = arith.constant 0 : i32
    %c0_i32_1 = arith.constant 0 : i32
    return %c0_i32, %c0_i32_0 : i32, i32
  }
  func.func @transform_4(%arg0: i32) -> (i32, i32) {
    %c0_i32 = arith.constant 0 : i32
    %c0_i32_0 = arith.constant 0 : i32
    %c0_i32_1 = arith.constant 0 : i32
    return %c0_i32, %c0_i32_0 : i32, i32
  }
  func.func @transform_5(%arg0: i32) -> (i32, i32) {
    %c0_i32 = arith.constant 0 : i32
    %c0_i32_0 = arith.constant 0 : i32
    return %arg0, %c0_i32 : i32, i32
  }
}

</mosaic_0001>

<bundles_post_ra>
// kernel: tpu_custom_call.1
= control target key start
LH: loop header
LB: loop body
LE: loop exit
PB: predicated region body
PF: predicated region fallthrough
CT: control target
= control target key end

     0   :  { %10 = vsyncpa [#allocation3], 0  ;;  %s503_s0 = inlined_call_operand.hbm [shape: f32[8,32], index: 0, kind: input, shape index: {}]   ;;  %s504_s1 = inlined_call_operand.hbm [shape: f32[32,128], index: 1, kind: input, shape index: {}]   ;;  %s505_s2 = inlined_call_operand.vmem [shape: f32[1,128], index: 2, kind: input, shape index: {}]   ;;  %s506_s3 = inlined_call_operand.hbm [shape: f32[128,128], index: 3, kind: input, shape index: {}]   ;;  %s507_s4 = inlined_call_operand.vmem [shape: f32[1,128], index: 4, kind: input, shape index: {}]   ;;  %s508_s5 = inlined_call_operand.hbm [shape: f32[8,128], index: 5, kind: output, shape index: {}]  }
   0x1   :  { %11 = vsyncpa [#allocation6], 0 }
   0x2   :  { %12 = vsyncpa [#allocation4], 0  ;;  %s425_s18 = smov [#allocation5]  }
   0x3   :  { %s28_s19 = sshll.u32 %s425_s18, 4  ;;  %s29_s19 = int_to_ptr.vmem [resolvable:$true] %s28_s19 }
   0x4   :  { %s347_s20 = scalar_lea.vmem %s29_s19, 512  ;;  %p352_p1 = scmp.lt.s32.totalorder %s29_s19, %s29_s19 }
   0x5   :  { %p348_p0 = scmp.ne.s32.totalorder %s29_s19, %s347_s20  ;;  %p353_p2 = scmp.lt.s32.totalorder %s347_s20, %s347_s20 }
   0x7   :  { %p354_p3 = por %p353_p2, %p352_p1 }
   0x9   :  { %p355_p4 = pnand %p354_p3, %p348_p0 }
   0xb   :  { %358 = shalt.err (!%p355_p4)
}
   0xc   :  { %s426_s21 = smov 128   ;;  %s427_s22 = smov 8  }
   0xd   :  { %34 = dma.hbm_to_vmem [thread:$0]  %s504_s1, 512, %s29_s19, [#allocation6], %s426_s21, %s426_s21, %s427_s22  }
   0xe   :  { %s428_s25 = smov [#allocation2]   ;;  %s429_s27 = smov [#allocation7]  }
   0xf   :  { %s19_s26 = sshll.u32 %s428_s25, 4  ;;  %s42_s28 = sshll.u32 %s429_s27, 4  ;;  %s20_s26 = int_to_ptr.vmem [resolvable:$true] %s19_s26  ;;  %s43_s28 = int_to_ptr.vmem [resolvable:$true] %s42_s28 }
  0x10   :  { %s367_s29 = scalar_lea.vmem %s20_s26, 128  ;;  %p372_p6 = scmp.lt.s32.totalorder %s20_s26, %s20_s26 }
  0x11   :  { %p368_p5 = scmp.ne.s32.totalorder %s20_s26, %s367_s29  ;;  %p373_p7 = scmp.lt.s32.totalorder %s367_s29, %s367_s29 }
  0x13   :  { %p374_p8 = por %p373_p7, %p372_p6 }
  0x15   :  { %p375_p9 = pnand %p374_p8, %p368_p5 }
  0x17   :  { %378 = shalt.err (!%p375_p9)
}
  0x18   :  { %22 = dma.hbm_to_vmem [thread:$0]  %s503_s0, 128, %s20_s26, [#allocation3]  }
  0x19   :  { %s387_s7 = scalar_lea.vmem %s43_s28, 2048  ;;  %p392_p11 = scmp.lt.s32.totalorder %s43_s28, %s43_s28 }
  0x1a   :  { %p388_p10 = scmp.ne.s32.totalorder %s43_s28, %s387_s7  ;;  %p393_p12 = scmp.lt.s32.totalorder %s387_s7, %s387_s7 }
  0x1c   :  { %p394_p13 = por %p393_p12, %p392_p11 }
  0x1e   :  { %p395_p0 = pnand %p394_p13, %p388_p10 }
  0x20   :  { %398 = shalt.err (!%p395_p0)
}
  0x21   :  { %48 = dma.hbm_to_vmem [thread:$0]  %s506_s3, 2048, %s43_s28, [#allocation6], %s426_s21, %s426_s21, %s427_s22  }
  0x22   :  { %419 = dma.done.wait [#allocation3], 128  }
  0x23   :  { %420 = vsyncadd [#allocation3], 4294967168 }
  0x24   :  { %421 = dma.done.wait [#allocation6], 2560  }
  0x25   :  { %422 = vsyncadd [#allocation6], 4294964736  ;;  %v430_v0 = vmov 0.0   ;;  %vm431_vm0 = vmmov 0   ;;  %v64_v1 = vld [vmem:[#allocation5 + $0x18] sm:$0xff]  ;;  %v63_v2 = vld [vmem:[#allocation5 + $0x10] sm:$0xff] }
  0x26   :  { %283 = vmatprep.subr.mxu0 %v430_v0  ;;  %291 = vmatprep.mubr.msk.f32.mxu0 %vm431_vm0, %v430_v0  ;;  %v162_v3 = vld [vmem:[#allocation7 + $0x78] sm:$0xff]  ;;  %v62_v4 = vld [vmem:[#allocation5 + $0x8] sm:$0xff]  ;;  %v161_v5 = vld [vmem:[#allocation7 + $0x70] sm:$0xff]  ;;  %vm72_vm1 = vcmask 261120   ;;  %s432_s11 = smov [#allocation8]  }
  0x27   :  { %294 = vmatprep.subr.mxu1 %v430_v0  ;;  %326 = vmatprep.mubr.msk.f32.mxu1 %vm431_vm0, %v430_v0  ;;  %v160_v6 = vld [vmem:[#allocation7 + $0x68] sm:$0xff]  ;;  %v61_v7 = vld [vmem:[#allocation5] sm:$0xff]  ;;  %v60_v8 = vld [vmem:[#allocation2] sm:$0xff]  ;;  %s248_s12 = sshll.u32 %s432_s11, 4  ;;  %s249_s12 = int_to_ptr.vmem [resolvable:$true] %s248_s12 }
  0x28   :  { %284 = vmatpush3.msra.mxu0 %v64_v1  ;;  %295 = vmatpush3.msra.mxu1 %v162_v3  ;;  %v159_v9 = vld [vmem:[#allocation7 + $0x60] sm:$0xff]  ;;  %v158_v10 = vld [vmem:[#allocation7 + $0x58] sm:$0xff]  ;;  %v157_v11 = vld [vmem:[#allocation7 + $0x50] sm:$0xff]  ;;  %s399_s13 = scalar_lea.vmem %s249_s12, 128  ;;  %p404_p2 = scmp.lt.s32.totalorder %s249_s12, %s249_s12 }
  0x29   :  { %285 = vmatprep.subr.mxu0 %v430_v0  ;;  %296 = vmatprep.subr.mxu1 %v430_v0  ;;  %v156_v12 = vld [vmem:[#allocation7 + $0x48] sm:$0xff]  ;;  %v155_v13 = vld [vmem:[#allocation7 + $0x40] sm:$0xff]  ;;  %v154_v14 = vld [vmem:[#allocation7 + $0x38] sm:$0xff]  ;;  %p400_p1 = scmp.ne.s32.totalorder %s249_s12, %s399_s13  ;;  %p405_p3 = scmp.lt.s32.totalorder %s399_s13, %s399_s13 }
  0x2a   :  { %286 = vmatpush3.msra.mxu0 %v63_v2  ;;  %297 = vmatpush3.msra.mxu1 %v161_v5  ;;  %v153_v15 = vld [vmem:[#allocation7 + $0x30] sm:$0xff]  ;;  %v152_v16 = vld [vmem:[#allocation7 + $0x28] sm:$0xff]  ;;  %v151_v17 = vld [vmem:[#allocation7 + $0x20] sm:$0xff] }
  0x2b   :  { %287 = vmatprep.subr.mxu0 %v430_v0  ;;  %298 = vmatprep.subr.mxu1 %v430_v0  ;;  %v150_v18 = vld [vmem:[#allocation7 + $0x18] sm:$0xff]  ;;  %v149_v19 = vld [vmem:[#allocation7 + $0x10] sm:$0xff]  ;;  %v148_v20 = vld [vmem:[#allocation7 + $0x8] sm:$0xff]  ;;  %p406_p4 = por %p405_p3, %p404_p2 }
  0x2c   :  { %288 = vmatpush3.msra.mxu0 %v62_v4  ;;  %299 = vmatpush3.msra.mxu1 %v160_v6  ;;  %v147_v21 = vld [vmem:[#allocation7] sm:$0xff]  ;;  %v258_v22 = vld [vmem:[%s505_s2] ss:$0 sm:$0xff] }
  0x2d   :  { %289 = vmatprep.subr.mxu0 %v430_v0  ;;  %300 = vmatprep.subr.mxu1 %v430_v0  ;;  %v260_v27 = vld [vmem:[%s507_s4] ss:$0 sm:$0xff]  ;;  %p407_p5 = pnand %p406_p4, %p400_p1 }
  0x2e   :  { %290 = vmatpush3.msra.mxu0 %v61_v7  ;;  %301 = vmatpush3.msra.mxu1 %v159_v9 }
  0x2f   :  { %292 = vmatmul.mubr.msk.f32.vlgmr.msra.gmra.mxu0 %vm72_vm1, %v60_v8  ;;  %302 = vmatprep.subr.mxu1 %v430_v0 }
  0x30   :  { %303 = vmatpush3.msra.mxu1 %v158_v10 }
  0x31   :  { %304 = vmatprep.subr.mxu1 %v430_v0 }
  0x32   :  { %305 = vmatpush3.msra.mxu1 %v157_v11 }
  0x33   :  { %306 = vmatprep.subr.mxu1 %v430_v0 }
  0x34   :  { %307 = vmatpush3.msra.mxu1 %v156_v12 }
  0x35   :  { %308 = vmatprep.subr.mxu1 %v430_v0 }
  0x36   :  { %309 = vmatpush3.msra.mxu1 %v155_v13 }
  0x37   :  { %310 = vmatprep.subr.mxu1 %v430_v0 }
  0x38   :  { %311 = vmatpush3.msra.mxu1 %v154_v14 }
  0x39   :  { %312 = vmatprep.subr.mxu1 %v430_v0 }
  0x3a   :  { %313 = vmatpush3.msra.mxu1 %v153_v15 }
  0x3b   :  { %314 = vmatprep.subr.mxu1 %v430_v0 }
  0x3c   :  { %315 = vmatpush3.msra.mxu1 %v152_v16 }
  0x3d   :  { %316 = vmatprep.subr.mxu1 %v430_v0 }
  0x3e   :  { %317 = vmatpush3.msra.mxu1 %v151_v17 }
  0x3f   :  { %318 = vmatprep.subr.mxu1 %v430_v0 }
  0x40   :  { %319 = vmatpush3.msra.mxu1 %v150_v18 }
  0x41   :  { %320 = vmatprep.subr.mxu1 %v430_v0 }
  0x42   :  { %321 = vmatpush3.msra.mxu1 %v149_v19 }
  0x43   :  { %322 = vmatprep.subr.mxu1 %v430_v0 }
  0x44   :  { %323 = vmatpush3.msra.mxu1 %v148_v20 }
  0x45   :  { %324 = vmatprep.subr.mxu1 %v430_v0 }
  0x46   :  { %325 = vmatpush3.msra.mxu1 %v147_v21 }
  0xef   :  { %v142_v23 = vpop.f32.mrf.mxu0 }
  0xf0   :  { %v143_v24 = vadd.f32 %v258_v22, %v142_v23 }
  0xf1   :  { %v293_v25 = vpop.f32.mrf.mxu0 }
  0xf2   :  { %v146_v26 = vmax.f32 %v143_v24, 0.0 }
  0xf4   :  { %327 = vmatmul.mubr.f32.vlgmr.msra.gmra.mxu1 %v146_v26 }
 0x1b4   :  { %v236_v28 = vpop.f32.mrf.mxu1 }
 0x1b5   :  { %v237_v29 = vadd.f32 %v260_v27, %v236_v28 }
 0x1b6   :  { %v328_v30 = vpop.f32.mrf.mxu1 }
 0x1b7   :  { %337 = vtanh.f32 %v237_v29 }
 0x1c4   :  { %v338_v31 = vpop.eup %337 }
 0x1c5   :  { %241 = vst [vmem:[#allocation8] sm:$0xff] %v338_v31 }
 0x1c6   :  { %410 = shalt.err (!%p407_p5)
}
 0x1c7   :  { %251 = dma.vmem_to_hbm [thread:$0]  %s249_s12, 128, %s508_s5, [#allocation4]  }
 0x1c8   :  { %423 = dma.done.wait [#allocation4], 128  }
 0x1c9   :  { %424 = vsyncadd [#allocation4], 4294967168 }
 0x1ca   :  { %255 = vsyncpa [#allocation3], 1 }
 0x1cb   :  { %256 = vsyncpa [#allocation6], 1 }
 0x1cc   :  { %257 = vsyncpa [#allocation4], 1 }

</bundles_post_ra>
